<compile_context>
chip_gen: v7x
topology: tpu7x:2x2x1
jax: 0.10.0
libtpu: 0.0.40
codegen_flags: <defaults>
</compile_context>

<pallas_src>
import functools
import math

import jax
import jax.numpy as jnp
from jax import lax
from jax.experimental import pallas as pl
from jax.experimental.pallas import tpu as pltpu


# ---------------------------------------------------------------------------
# Sinusoidal table (JAX port of the PyTorch generate_encoder)
# ---------------------------------------------------------------------------
def generate_encoder(in_channels: int, max_len: int) -> jnp.ndarray:
    pos = jnp.arange(max_len, dtype=jnp.float32)[:, None]           # (max_len, 1)
    i = jnp.arange(in_channels, dtype=jnp.float32)[None, :]         # (1, C)
    angle_rates = 1.0 / jnp.power(
        10000.0, 2.0 * jnp.floor(i / 2.0) / float(in_channels))
    pe = pos * angle_rates                                           # (max_len, C)
    even = (jnp.arange(in_channels) % 2 == 0)[None, :]
    return jnp.where(even, jnp.sin(pe), jnp.cos(pe))                 # (max_len, C)


# ---------------------------------------------------------------------------
# Generation-aware tile / VMEM budgets
# ---------------------------------------------------------------------------
_MIN_TILE_BYTES = 2 << 20       # keep tiles >= ~2 MiB when splitting for parallelism
_MIN_PARALLEL_BLOCKS = 8        # v7x: 2 TensorCores; also amortizes pipeline ramp
_MAX_POOL_COL_TILE = 8192       # <= 64 unrolled VPU adds per pool grid step


def _cdiv(a: int, b: int) -> int:
    return -(-a // b)


@functools.lru_cache(maxsize=1)
def _vmem_limit_bytes() -> int:
    """Scoped-VMEM budget: ~64 MiB on v5e/v6e (128 MiB VMEM), ~48 MiB on v7x."""
    try:
        cap = int(getattr(pltpu.get_tpu_info(), "vmem_capacity_bytes"))
        limit = min(64 * 1024 * 1024, cap - 16 * 1024 * 1024)
    except Exception:
        limit = 48 * 1024 * 1024      # safe on every generation (v7x has 64 MiB)
    return int(max(32 * 1024 * 1024, limit))


def _target_tile_bytes() -> int:
    # ~4 double-buffered full-size tiles live (x-in + out) plus side inputs.
    return max(_MIN_TILE_BYTES, _vmem_limit_bytes() // 8)


def _pick_row_tile(num_rows: int, bytes_per_row: int, target_bytes: int) -> int:
    """Largest row tile fitting `target_bytes`, capped so the 'parallel' grid
    axis keeps several blocks (2-TC sharding on v7x + pipeline overlap) as long
    as tiles stay >= ~2 MiB.  No divisibility requirement: grids use cdiv."""
    bytes_per_row = max(1, bytes_per_row)
    tr = max(1, min(num_rows, target_bytes // bytes_per_row))
    min_rows = max(1, _MIN_TILE_BYTES // bytes_per_row)
    cap = max(min_rows, _cdiv(num_rows, _MIN_PARALLEL_BLOCKS))
    return int(max(1, min(tr, cap)))


def _pool_tiles(num_rows: int, num_cols: int, bytes_per_elem: int,
                target_bytes: int):
    """(tr, tc) for the 2-D pool block, respecting the (8, 128) rule."""
    if num_cols >= 128:
        tc = max(128, min(_MAX_POOL_COL_TILE, (num_cols // 128) * 128))
    else:
        tc = num_cols                              # full extent (< 128 lanes)
    tr = _pick_row_tile(num_rows, tc * bytes_per_elem, target_bytes)
    if tr >= num_rows:
        tr = num_rows                              # full extent: always legal
    elif tr >= 8:
        tr = (tr // 8) * 8                         # multiple of 8
    else:
        tr = num_rows if num_rows < 8 else 8
    return tr, tc


# ---------------------------------------------------------------------------
# Kernel 1: global average pool over the flattened spatial axis
# ---------------------------------------------------------------------------
def _pool_kernel(x_ref, o_ref, acc_ref, *, inv_n, total_cols, col_tile,
                 chunk_width, num_chunks, mask_cols):
    j = pl.program_id(1)

    @pl.when(j == 0)
    def _():
        acc_ref[...] = jnp.zeros_like(acc_ref)

    x = x_ref[...].astype(jnp.float32)
    if mask_cols:
        # cdiv grid: zero the padded tail columns before accumulating.
        col_ids = j * col_tile + lax.broadcasted_iota(jnp.int32, x.shape, 1)
        x = jnp.where(col_ids < total_cols, x, 0.0)

    # Lane-parallel partial sums on the VPU each step; the single cross-lane
    # reduce (+ 1/N scale) is deferred to the last-step epilogue.
    acc = acc_ref[...]
    for s in range(num_chunks):
        acc = acc + x[:, s * chunk_width:(s + 1) * chunk_width]
    acc_ref[...] = acc

    @pl.when(j == pl.num_programs(1) - 1)
    def _():
        o_ref[...] = jnp.sum(acc_ref[...], axis=-1, keepdims=True) * inv_n


def _global_avg_pool(x2: jnp.ndarray) -> jnp.ndarray:
    """x2: [R, N] -> float32 [R, 1] row means (Pallas tiled reduction)."""
    R, N = x2.shape
    bpe = x2.dtype.itemsize
    tr, tc = _pool_tiles(R, N, bpe, _target_tile_bytes())
    grid = (_cdiv(R, tr), _cdiv(N, tc))
    chunk_width = min(tc, 128)

    kernel = functools.partial(
        _pool_kernel, inv_n=1.0 / float(N), total_cols=N, col_tile=tc,
        chunk_width=chunk_width, num_chunks=tc // chunk_width,
        mask_cols=(N % tc != 0))

    return pl.pallas_call(
        kernel,
        out_shape=jax.ShapeDtypeStruct((R, 1), jnp.float32),
        grid_spec=pltpu.PrefetchScalarGridSpec(
            num_scalar_prefetch=0,
            grid=grid,
            in_specs=[pl.BlockSpec((tr, tc), lambda i, j: (i, j))],
            out_specs=pl.BlockSpec((tr, 1), lambda i, j: (i, 0)),
            scratch_shapes=[pltpu.VMEM((tr, chunk_width), jnp.float32)],
        ),
        compiler_params=pltpu.CompilerParams(
            dimension_semantics=("parallel", "arbitrary"),
            vmem_limit_bytes=_vmem_limit_bytes()),
        cost_estimate=pl.CostEstimate(
            flops=int(R * N), transcendentals=0,
            bytes_accessed=int(R * N * bpe + R * 4)),
    )(x2)


# ---------------------------------------------------------------------------
# Kernel 2: out[r, h, w] = x[r, h, w] + h_add[r, h] + w_add[r, w]
# ---------------------------------------------------------------------------
def _add_pos_kernel(x_ref, h_ref, w_ref, o_ref):
    # x_ref: (TR, H, W); h_ref: (TR, H, 1); w_ref: (TR, 1, W).
    # Pre-shaped side inputs: the H broadcast is a lane splat, the W broadcast
    # a sublane splat -- no (TR, H, W) "pos" temporary and no relayout.
    out = (x_ref[...].astype(jnp.float32) + h_ref[...]) + w_ref[...]
    o_ref[...] = out.astype(o_ref.dtype)


def _broadcast_add_pos(x3: jnp.ndarray, h_add: jnp.ndarray,
                       w_add: jnp.ndarray) -> jnp.ndarray:
    R, H, W = x3.shape
    bpe = x3.dtype.itemsize
    # TODO(synk): if a single (H, W) slab ever exceeded the tile budget the H
    # axis would need tiling too; with max_h = max_w = 250 it cannot.
    tr = _pick_row_tile(R, H * W * bpe, _target_tile_bytes())
    grid = (_cdiv(R, tr),)

    bytes_accessed = 2 * R * H * W * bpe + (R * H + R * W) * 4
    return pl.pallas_call(
        _add_pos_kernel,
        out_shape=jax.ShapeDtypeStruct((R, H, W), x3.dtype),
        grid_spec=pltpu.PrefetchScalarGridSpec(
            num_scalar_prefetch=0,
            grid=grid,
            in_specs=[
                pl.BlockSpec((tr, H, W), lambda i: (i, 0, 0)),
                pl.BlockSpec((tr, H, 1), lambda i: (i, 0, 0)),
                pl.BlockSpec((tr, 1, W), lambda i: (i, 0, 0)),
            ],
            out_specs=pl.BlockSpec((tr, H, W), lambda i: (i, 0, 0)),
        ),
        compiler_params=pltpu.CompilerParams(
            dimension_semantics=("parallel",),
            vmem_limit_bytes=_vmem_limit_bytes()),
        cost_estimate=pl.CostEstimate(
            flops=int(2 * R * H * W), transcendentals=0,
            bytes_accessed=int(bytes_accessed)),
    )(x3, h_add, w_add)


# ---------------------------------------------------------------------------
# Tiny adaptive-scale branch: 1x1 convs on a [B, C, 1, 1] tensor == dense MLP
# ---------------------------------------------------------------------------
def _scale_mlp(avg, w1, b1, w2, b2):
    hidden = jnp.maximum(avg @ w1.T + b1, 0.0)
    return jax.nn.sigmoid(hidden @ w2.T + b2)


# ---------------------------------------------------------------------------
# Module mirror (inference path)
# ---------------------------------------------------------------------------
class Adaptive2DPositionEncoder:
    def __init__(self, in_channels, max_h=250, max_w=250, dropout=0.1, *, key):
        C = in_channels
        # Tables stored transposed, matching the PyTorch buffers' (1, C, L, 1) view.
        self.h_pe = generate_encoder(C, max_h).T                     # (C, max_h)
        self.w_pe = generate_encoder(C, max_w).T                     # (C, max_w)

        ks = jax.random.split(key, 8)
        bound = 1.0 / math.sqrt(C)

        def _u(k, shape):
            return jax.random.uniform(k, shape, jnp.float32, -bound, bound)

        self.h_w1, self.h_b1 = _u(ks[0], (C, C)), _u(ks[1], (C,))
        self.h_w2, self.h_b2 = _u(ks[2], (C, C)), _u(ks[3], (C,))
        self.w_w1, self.w_b1 = _u(ks[4], (C, C)), _u(ks[5], (C,))
        self.w_w2, self.w_b2 = _u(ks[6], (C, C)), _u(ks[7], (C,))
        self.dropout_p = dropout   # eval mode: identity

    def __call__(self, x):
        B, C, H, W = x.shape
        R = B * C

        # 1) global average pool (Pallas reduction) -> [B, C] float32
        avg = _global_avg_pool(x.reshape(R, H * W)).reshape(B, C)

        # 2) adaptive scales (tiny dense MLPs; negligible next to the HBM passes)
        h_scale = _scale_mlp(avg, self.h_w1, self.h_b1, self.h_w2, self.h_b2)   # [B, C]
        w_scale = _scale_mlp(avg, self.w_w1, self.w_b1, self.w_w2, self.w_b2)   # [B, C]

        # 3) per-(b, c) additive vectors, pre-shaped for lane/sublane splats.
        h_add = (h_scale[:, :, None] * self.h_pe[None, :, :H]
                 ).reshape(R, H, 1).astype(jnp.float32)
        w_add = (w_scale[:, :, None] * self.w_pe[None, :, :W]
                 ).reshape(R, 1, W).astype(jnp.float32)

        # 4) HBM-bound broadcast add (Pallas)
        out = _broadcast_add_pos(x.reshape(R, H, W), h_add, w_add)

        # 5) dropout: identity in eval mode.
        # TODO(synk): training-mode dropout via pltpu.prng_seed/prng_random_bits.
        return out.reshape(B, C, H, W)


# ---------------------------------------------------------------------------
# Plain-JAX reference (mirrors the PyTorch forward) and self-test
# ---------------------------------------------------------------------------
def _reference_forward(module, x):
    B, C, H, W = x.shape
    avg = jnp.mean(x.astype(jnp.float32), axis=(2, 3))               # [B, C]
    hs = _scale_mlp(avg, module.h_w1, module.h_b1, module.h_w2, module.h_b2)
    ws = _scale_mlp(avg, module.w_w1, module.w_b1, module.w_w2, module.w_b2)
    h_pos = hs[:, :, None, None] * module.h_pe[None, :, :H, None]    # (B, C, H, 1)
    w_pos = ws[:, :, None, None] * module.w_pe[None, :, None, :W]    # (B, C, 1, W)
    return (x.astype(jnp.float32) + h_pos + w_pos).astype(x.dtype)


def _run_case(B, C, H, W, key):
    k_x, k_params = jax.random.split(key)
    x = jax.random.normal(k_x, (B, C, H, W), dtype=jnp.float32)
    module = Adaptive2DPositionEncoder(in_channels=C, max_h=250, max_w=250,
                                       dropout=0.1, key=k_params)
    out = jax.block_until_ready(module(x))
    ref = _reference_forward(module, x)
    assert out.shape == (B, C, H, W), out.shape
    max_err = float(jnp.max(jnp.abs(out - ref)))
    assert jnp.allclose(out, ref, atol=1e-5, rtol=1e-5), f"max_err={max_err}"


if __name__ == "__main__":
    key = jax.random.PRNGKey(0)
    k1, k2 = jax.random.split(key)

    # Primary small case.
    _run_case(2, 4, 16, 16, k1)
    # Awkward shape: exercises cdiv grids, padded-column masking and
    # non-multiple-of-8 row counts.
    _run_case(3, 5, 9, 20, k2)

    print("KERNEL_OK")
</pallas_src>

<mosaic_0001>
module attributes {stable_mosaic.version = 11 : i64} {
  func.func @_pool_kernel(%arg0: i32, %arg1: i32, %arg2: memref<8x256xf32, #tpu.memory_space<vmem>>, %arg3: memref<8x1xf32, #tpu.memory_space<vmem>>, %arg4: memref<8x128xf32, #tpu.memory_space<vmem>>) attributes {dimension_semantics = [#tpu.dimension_semantics<parallel>, #tpu.dimension_semantics<arbitrary>], iteration_bounds = array<i64: 1, 1>, scalar_prefetch = 0 : i64, scratch_operands = 1 : i64, tpu.core_type = #tpu.core_type<tc>, window_params = [{transform_indices = @transform_0, window_bounds = array<i64: 8, 256>}, {transform_indices = @transform_1, window_bounds = array<i64: 8, 1>}]} {
    %c0_i32 = arith.constant 0 : i32
    %0 = arith.cmpi eq, %arg1, %c0_i32 : i32
    %1 = arith.extui %0 : i1 to i32
    %c0_i32_0 = arith.constant 0 : i32
    %2 = arith.cmpi ne, %1, %c0_i32_0 : i32
    scf.if %2 {
      %cst = arith.constant 0.000000e+00 : f32
      %13 = vector.broadcast %cst : f32 to vector<8x128xf32>
      %c0_8 = arith.constant 0 : index
      %c0_9 = arith.constant 0 : index
      %14 = vector.load %arg4[%c0_8, %c0_9] : memref<8x128xf32, #tpu.memory_space<vmem>>, vector<8x128xf32>
      tpu.vector_store %arg4[%c0_8, %c0_9], %13 {strides = array<i32>} : memref<8x128xf32, #tpu.memory_space<vmem>>, vector<8x128xf32>,
    } else {
    }
    %c0 = arith.constant 0 : index
    %c0_1 = arith.constant 0 : index
    %3 = vector.load %arg2[%c0, %c0_1] : memref<8x256xf32, #tpu.memory_space<vmem>>, vector<8x256xf32>
    %c0_2 = arith.constant 0 : index
    %c0_3 = arith.constant 0 : index
    %4 = vector.load %arg4[%c0_2, %c0_3] : memref<8x128xf32, #tpu.memory_space<vmem>>, vector<8x128xf32>
    %5 = vector.extract_strided_slice %3 {offsets = [0, 0], sizes = [8, 128], strides = [1, 1]} : vector<8x256xf32> to vector<8x128xf32>
    %6 = arith.addf %4, %5 : vector<8x128xf32>
    %7 = vector.extract_strided_slice %3 {offsets = [0, 128], sizes = [8, 128], strides = [1, 1]} : vector<8x256xf32> to vector<8x128xf32>
    %8 = arith.addf %6, %7 : vector<8x128xf32>
    %c0_4 = arith.constant 0 : index
    %c0_5 = arith.constant 0 : index
    %9 = vector.load %arg4[%c0_4, %c0_5] : memref<8x128xf32, #tpu.memory_space<vmem>>, vector<8x128xf32>
    tpu.vector_store %arg4[%c0_4, %c0_5], %8 {strides = array<i32>} : memref<8x128xf32, #tpu.memory_space<vmem>>, vector<8x128xf32>,
    %c0_i32_6 = arith.constant 0 : i32
    %10 = arith.cmpi eq, %arg1, %c0_i32_6 : i32
    %11 = arith.extui %10 : i1 to i32
    %c0_i32_7 = arith.constant 0 : i32
    %12 = arith.cmpi ne, %11, %c0_i32_7 : i32
    scf.if %12 {
      %c0_8 = arith.constant 0 : index
      %c0_9 = arith.constant 0 : index
      %13 = vector.load %arg4[%c0_8, %c0_9] : memref<8x128xf32, #tpu.memory_space<vmem>>, vector<8x128xf32>
      %cst = arith.constant dense<0.000000e+00> : vector<8xf32>
      %14 = vector.multi_reduction <add>, %13, %cst [1] : vector<8x128xf32> to vector<8xf32>
      %15 = vector.shape_cast %14 : vector<8xf32> to vector<8x1xf32>
      %cst_10 = arith.constant 3.906250e-03 : f32
      %16 = vector.broadcast %cst_10 : f32 to vector<8x1xf32>
      %17 = arith.mulf %15, %16 : vector<8x1xf32>
      %c0_11 = arith.constant 0 : index
      %c0_12 = arith.constant 0 : index
      %18 = vector.load %arg3[%c0_11, %c0_12] : memref<8x1xf32, #tpu.memory_space<vmem>>, vector<8x1xf32>
      tpu.vector_store %arg3[%c0_11, %c0_12], %17 {strides = array<i32>} : memref<8x1xf32, #tpu.memory_space<vmem>>, vector<8x1xf32>,
    } else {
    }
    return
  }
  func.func @transform_0(%arg0: i32, %arg1: i32) -> (i32, i32) {
    %c0_i32 = arith.constant 0 : i32
    return %arg0, %arg1 : i32, i32
  }
  func.func @transform_1(%arg0: i32, %arg1: i32) -> (i32, i32) {
    %c0_i32 = arith.constant 0 : i32
    %c0_i32_0 = arith.constant 0 : i32
    return %arg0, %c0_i32 : i32, i32
  }
}

</mosaic_0001>

<bundles_post_ra>
// kernel: tpu_custom_call.1
= control target key start
LH: loop header
LB: loop body
LE: loop exit
PB: predicated region body
PF: predicated region fallthrough
CT: control target
= control target key end

     0   :  { %6 = vsyncpa [#allocation4], 0  ;;  %s70_s6 = smov [#allocation3]   ;;  %s96_s0 = inlined_call_operand.hbm [shape: f32[8,256], index: 0, kind: input, shape index: {}]   ;;  %s97_s1 = inlined_call_operand.vmem [shape: f32[8,1], index: 1, kind: output, shape index: {}]  }
   0x1   :  { %s13_s7 = sshll.u32 %s70_s6, 4  ;;  %s46_s10 = scalar_lea.hbm %s96_s0, 256  ;;  %s14_s7 = int_to_ptr.vmem [resolvable:$true] %s13_s7 }
   0x2   :  { %p47_p0 = scmp.ne.s32.totalorder %s96_s0, %s46_s10  ;;  %p50_p1 = scmp.lt.u32.totalorder %s46_s10, %s96_s0 }
   0x4   :  { %p52_p2 = pnand %p50_p1, %p47_p0 }
   0x6   :  { %55 = shalt.err (!%p52_p2)
}
   0x7   :  { %s56_s15 = scalar_lea.vmem %s14_s7, 256  ;;  %p61_p4 = scmp.lt.s32.totalorder %s14_s7, %s14_s7 }
   0x8   :  { %p57_p3 = scmp.ne.s32.totalorder %s14_s7, %s56_s15  ;;  %p62_p5 = scmp.lt.s32.totalorder %s56_s15, %s56_s15 }
   0xa   :  { %p63_p6 = por %p62_p5, %p61_p4 }
   0xc   :  { %p64_p7 = pnand %p63_p6, %p57_p3 }
   0xe   :  { %67 = shalt.err (!%p64_p7)
}
   0xf   :  { %16 = dma.hbm_to_vmem [thread:$0]  %s96_s0, 256, %s14_s7, [#allocation4]  }
  0x10   :  { %68 = dma.done.wait [#allocation4], 256  }
  0x11   :  { %69 = vsyncadd [#allocation4], 4294967040  ;;  %v25_v0 = vld [vmem:[#allocation3] sm:$0xff]  ;;  %v26_v1 = vld [vmem:[#allocation3 + $0x8] sm:$0xff]  ;;  %vm38_vm0 = vcmask 7168  }
  0x12   :  { %v29_v2 = vadd.f32 %v26_v1, %v25_v0 }
  0x14   :  { %35 = vadd.xlane.f32.xlu0 %v29_v2 }
  0xa1   :  { %v36_v3 = vpop.xlane.xlu0 %35 }
  0xa2   :  { %v37_v4 = vmul.f32 0.00390625, %v36_v3 }
  0xa4   :  { %39 = vst.msk [vmem:[%s97_s1] sm:$0xff] %vm38_vm0, %v37_v4 }
  0xa5   :  { %44 = vsyncpa [#allocation4], 1 }

</bundles_post_ra>
